<compile_context>
chip_gen: v5e
topology: v5e:2x2
jax: 0.10.0
libtpu: 0.0.40
codegen_flags: <defaults>
</compile_context>

<pallas_src>
import numpy as np
import jax
import jax.numpy as jnp
from jax.experimental import pallas as pl
from jax.experimental.pallas import tpu as pltpu


def _cdiv(a, b):
    return -(-a // b)


def _round_up(v, m):
    return _cdiv(v, m) * m


def _choose_row_group(h, w):
    """Pack gh input rows into the lane dim so each output row is >=128 lanes
    (avoids masked partial stores for small W). gh must divide H; gh=1 when
    4W is already lane-dense."""
    if 4 * w >= 128:
        return 1
    target = _cdiv(128, 4 * w)
    for g in range(1, h + 1):
        if h % g == 0 and g >= target:
            return g
    return h


def _build_iwt_matrix(w, gh, dtype):
    """M[k, jj, ll]: coefficient of sub-band k, input lane jj, output lane ll.

    Input lanes pack gh consecutive input rows: jj = r*W + j.
    Output lanes pack the corresponding 2*gh output rows with the even/odd
    column interleave applied:
        ll = r*4W + rr*2W + 2j + c   <->   h[2*(i*gh + r) + rr, 2j + c]
    so a kernel result row is already in the final contiguous layout.
    The 1/2 scale is folded in; entries are exactly +/-0.5.
    """
    m = np.zeros((4, gh * w, gh * 4 * w), dtype=np.float32)
    j = np.arange(w)
    for r in range(gh):
        for rr in (0, 1):
            for c in (0, 1):
                jj = r * w + j
                ll = r * 4 * w + rr * 2 * w + 2 * j + c
                s2 = 1.0 if c == 1 else -1.0   # sign of x2
                s3 = 1.0 if rr == 1 else -1.0  # sign of x3
                m[0, jj, ll] = 0.5
                m[1, jj, ll] = 0.5 * s2
                m[2, jj, ll] = 0.5 * s3
                m[3, jj, ll] = 0.5 * s2 * s3   # sign of x4
    return jnp.asarray(m, dtype=dtype)


def _iwt_kernel(x_ref, m_ref, o_ref):
    # x_ref: (tile_n, 4, Hg, gh*W)   m_ref: (4, gh*W, gh*4W)
    # o_ref: (tile_n, Hg, gh*4W)
    tn, _, hg, kdim = x_ref.shape
    rows = tn * hg
    # 4 large batched dots (static unroll over sub-bands) instead of a per-item
    # loop of tiny matmuls: M-dim = tile_n*Hg keeps the MXU full.
    acc = jnp.dot(x_ref[:, 0].reshape(rows, kdim), m_ref[0],
                  preferred_element_type=jnp.float32)
    for k in range(1, 4):
        acc = acc + jnp.dot(x_ref[:, k].reshape(rows, kdim), m_ref[k],
                            preferred_element_type=jnp.float32)
    o_ref[...] = acc.reshape(o_ref.shape).astype(o_ref.dtype)


def _vmem_budget_bytes():
    """Generation-aware VMEM budget for the double-buffered blocks."""
    cap = None
    try:
        cap = getattr(pltpu.get_tpu_info(), "vmem_capacity_bytes", None)
    except Exception:
        cap = None
    if cap is None:
        cap = 64 << 20                       # conservative (v7x per-TC size)
    if cap >= (96 << 20):                    # v5e / v6e: 128 MiB physical VMEM
        return 40 << 20
    return 20 << 20                          # v7x: 64 MiB per TC


def _choose_tile_n(n, hg, ghw, in_itemsize, out_itemsize, budget_bytes):
    """Items per grid step: biggest that fits the budget (double-buffered
    blocks + matmul intermediates), then capped so the grid has >= 4
    (preferably even) steps so both v7x TensorCores pipeline."""
    in_per_n = 4 * _round_up(hg, 8) * _round_up(ghw, 128) * in_itemsize
    out_per_n = _round_up(hg, 8) * _round_up(4 * ghw, 128) * out_itemsize
    acc_per_n = _round_up(hg, 8) * _round_up(4 * ghw, 128) * 4            # f32 acc
    lhs_per_n = _round_up(hg, 8) * _round_up(ghw, 128) * in_itemsize      # one slice
    m_bytes = 2 * 4 * _round_up(ghw, 8) * _round_up(4 * ghw, 128) * in_itemsize
    per_n = 2 * (in_per_n + out_per_n) + acc_per_n + lhs_per_n            # 2x: dbl buf
    t = int(max(1, min(n, (budget_bytes - m_bytes) // per_n)))
    if n >= 4:
        t = min(t, _cdiv(n, 4))      # >= 4 grid steps (>= 2 per v7x TensorCore)
    steps = _cdiv(n, t)
    if steps > 1 and steps % 2:      # prefer an even step count across 2 TCs
        t = max(1, _cdiv(n, steps + 1))
    return int(t)


def iwt_forward(x, *, tile_n=None, out_dtype=jnp.float32):
    """Pallas-TPU IWT: (B, T, C, 4, H, W) -> (B, T, C, 2H, 2W) in out_dtype."""
    b, t, c, f, h, w = x.shape
    assert f == 4, "IWT expects 4 sub-bands on axis 3"
    n = b * t * c
    out_dtype = np.dtype(out_dtype)

    gh = _choose_row_group(h, w)
    hg, ghw = h // gh, gh * w

    # Contiguous (free) reshape only -- no HBM transpose anywhere.
    x_flat = jnp.reshape(x, (n, 4, hg, ghw))
    mat = _build_iwt_matrix(w, gh, x.dtype)          # (4, gh*W, gh*4W) constant

    budget = _vmem_budget_bytes()
    if tile_n is None:
        tile_n = _choose_tile_n(n, hg, ghw, x.dtype.itemsize,
                                out_dtype.itemsize, budget)
    tile_n = int(max(1, min(tile_n, n)))
    grid = (max(1, _cdiv(n, tile_n)),)   # non-divisible n: partial last block is masked

    flops = 2 * n * hg * 4 * ghw * (4 * ghw)
    bytes_accessed = (x_flat.size * x.dtype.itemsize
                      + n * hg * 4 * ghw * out_dtype.itemsize
                      + mat.size * mat.dtype.itemsize)

    out = pl.pallas_call(
        _iwt_kernel,
        out_shape=jax.ShapeDtypeStruct((n, hg, 4 * ghw), out_dtype),
        grid_spec=pltpu.PrefetchScalarGridSpec(
            num_scalar_prefetch=0,
            grid=grid,
            in_specs=[
                pl.BlockSpec((tile_n, 4, hg, ghw), lambda i: (i, 0, 0, 0)),
                pl.BlockSpec((4, ghw, 4 * ghw), lambda i: (0, 0, 0)),
            ],
            out_specs=pl.BlockSpec((tile_n, hg, 4 * ghw), lambda i: (i, 0, 0)),
        ),
        compiler_params=pltpu.CompilerParams(
            dimension_semantics=("parallel",),
            vmem_limit_bytes=int(budget + (8 << 20))),
        cost_estimate=pl.CostEstimate(flops=int(flops), transcendentals=0,
                                      bytes_accessed=int(bytes_accessed)),
    )(x_flat, mat)

    # (N, Hg, gh*4W) flattens in exactly the (B, T, C, 2H, 2W) element order.
    return jnp.reshape(out, (b, t, c, 2 * h, 2 * w))


def _iwt_reference(x):
    """Pure-JAX replica of the PyTorch iwt_init for correctness checking."""
    b, t, c, f, h, w = x.shape
    x1 = x[:, :, :, 0] / 2
    x2 = x[:, :, :, 1] / 2
    x3 = x[:, :, :, 2] / 2
    x4 = x[:, :, :, 3] / 2
    out = jnp.zeros((b, t, c, 2 * h, 2 * w), dtype=jnp.float32)
    out = out.at[:, :, :, 0::2, 0::2].set(x1 - x2 - x3 + x4)
    out = out.at[:, :, :, 1::2, 0::2].set(x1 - x2 + x3 - x4)
    out = out.at[:, :, :, 0::2, 1::2].set(x1 + x2 - x3 - x4)
    out = out.at[:, :, :, 1::2, 1::2].set(x1 + x2 + x3 + x4)
    return out


def _check(x):
    out = jax.block_until_ready(jax.jit(iwt_forward)(x))
    ref = _iwt_reference(x)
    b, t, c, _, h, w = x.shape
    assert out.shape == (b, t, c, 2 * h, 2 * w), out.shape
    assert out.dtype == jnp.float32, out.dtype
    err = float(jnp.max(jnp.abs(out - ref)))
    assert err < 1e-5, f"mismatch vs reference: {err}"


if __name__ == "__main__":
    key = jax.random.PRNGKey(0)
    # Keep test values exactly representable in bf16 so the check is
    # insensitive to the MXU's f32 matmul pass policy.
    B, T, C, H, W = 2, 2, 4, 8, 8              # input spatial 8 -> output 16
    k1, k2 = jax.random.split(key)
    x = jax.random.normal(k1, (B, T, C, 4, H, W), dtype=jnp.float32)
    x = x.astype(jnp.bfloat16).astype(jnp.float32)
    _check(x)

    # Awkward (non-divisible) batch count exercises the masked partial block.
    x2 = jax.random.normal(k2, (1, 3, 7, 4, H, W), dtype=jnp.float32)
    x2 = x2.astype(jnp.bfloat16).astype(jnp.float32)
    _check(x2)

    print("KERNEL_OK")
</pallas_src>

<mosaic_0001>
module attributes {stable_mosaic.version = 11 : i64} {
  func.func @_iwt_kernel(%arg0: i32, %arg1: memref<4x4x2x32xf32, #tpu.memory_space<vmem>>, %arg2: memref<4x32x128xf32, #tpu.memory_space<vmem>>, %arg3: memref<4x2x128xf32, #tpu.memory_space<vmem>>) attributes {dimension_semantics = [#tpu.dimension_semantics<parallel>], iteration_bounds = array<i64: 4>, scalar_prefetch = 0 : i64, scratch_operands = 0 : i64, tpu.core_type = #tpu.core_type<tc>, window_params = [{transform_indices = @transform_0, window_bounds = array<i64: 4, 4, 2, 32>}, {pipeline_mode = #tpu.pipeline_mode<synchronous>, transform_indices = @transform_1, window_bounds = array<i64: 4, 32, 128>}, {transform_indices = @transform_2, window_bounds = array<i64: 4, 2, 128>}]} {
    %c0 = arith.constant 0 : index
    %c0_0 = arith.constant 0 : index
    %c0_1 = arith.constant 0 : index
    %c0_2 = arith.constant 0 : index
    %0 = vector.load %arg1[%c0, %c0_0, %c0_1, %c0_2] : memref<4x4x2x32xf32, #tpu.memory_space<vmem>>, vector<4x1x2x32xf32>
    %1 = vector.shape_cast %0 : vector<4x1x2x32xf32> to vector<4x2x32xf32>
    %2 = vector.shape_cast %1 : vector<4x2x32xf32> to vector<8x32xf32>
    %c0_3 = arith.constant 0 : index
    %c0_4 = arith.constant 0 : index
    %c0_5 = arith.constant 0 : index
    %3 = vector.load %arg2[%c0_3, %c0_4, %c0_5] : memref<4x32x128xf32, #tpu.memory_space<vmem>>, vector<1x32x128xf32>
    %4 = vector.shape_cast %3 : vector<1x32x128xf32> to vector<32x128xf32>
    %cst = arith.constant dense<0.000000e+00> : vector<8x128xf32>
    %5 = tpu.matmul %2, %4, %cst {dimension_numbers = #tpu.dot_dimension_numbers<[1], [0], [0], [1], [0, 0, 1, 1], [], []>} : vector<8x32xf32>, vector<32x128xf32>, vector<8x128xf32> -> vector<8x128xf32>
    %c0_6 = arith.constant 0 : index
    %c1 = arith.constant 1 : index
    %c0_7 = arith.constant 0 : index
    %c0_8 = arith.constant 0 : index
    %6 = vector.load %arg1[%c0_6, %c1, %c0_7, %c0_8] : memref<4x4x2x32xf32, #tpu.memory_space<vmem>>, vector<4x1x2x32xf32>
    %7 = vector.shape_cast %6 : vector<4x1x2x32xf32> to vector<4x2x32xf32>
    %8 = vector.shape_cast %7 : vector<4x2x32xf32> to vector<8x32xf32>
    %c1_9 = arith.constant 1 : index
    %c0_10 = arith.constant 0 : index
    %c0_11 = arith.constant 0 : index
    %9 = vector.load %arg2[%c1_9, %c0_10, %c0_11] : memref<4x32x128xf32, #tpu.memory_space<vmem>>, vector<1x32x128xf32>
    %10 = vector.shape_cast %9 : vector<1x32x128xf32> to vector<32x128xf32>
    %cst_12 = arith.constant dense<0.000000e+00> : vector<8x128xf32>
    %11 = tpu.matmul %8, %10, %cst_12 {dimension_numbers = #tpu.dot_dimension_numbers<[1], [0], [0], [1], [0, 0, 1, 1], [], []>} : vector<8x32xf32>, vector<32x128xf32>, vector<8x128xf32> -> vector<8x128xf32>
    %12 = arith.addf %5, %11 : vector<8x128xf32>
    %c0_13 = arith.constant 0 : index
    %c2 = arith.constant 2 : index
    %c0_14 = arith.constant 0 : index
    %c0_15 = arith.constant 0 : index
    %13 = vector.load %arg1[%c0_13, %c2, %c0_14, %c0_15] : memref<4x4x2x32xf32, #tpu.memory_space<vmem>>, vector<4x1x2x32xf32>
    %14 = vector.shape_cast %13 : vector<4x1x2x32xf32> to vector<4x2x32xf32>
    %15 = vector.shape_cast %14 : vector<4x2x32xf32> to vector<8x32xf32>
    %c2_16 = arith.constant 2 : index
    %c0_17 = arith.constant 0 : index
    %c0_18 = arith.constant 0 : index
    %16 = vector.load %arg2[%c2_16, %c0_17, %c0_18] : memref<4x32x128xf32, #tpu.memory_space<vmem>>, vector<1x32x128xf32>
    %17 = vector.shape_cast %16 : vector<1x32x128xf32> to vector<32x128xf32>
    %cst_19 = arith.constant dense<0.000000e+00> : vector<8x128xf32>
    %18 = tpu.matmul %15, %17, %cst_19 {dimension_numbers = #tpu.dot_dimension_numbers<[1], [0], [0], [1], [0, 0, 1, 1], [], []>} : vector<8x32xf32>, vector<32x128xf32>, vector<8x128xf32> -> vector<8x128xf32>
    %19 = arith.addf %12, %18 : vector<8x128xf32>
    %c0_20 = arith.constant 0 : index
    %c3 = arith.constant 3 : index
    %c0_21 = arith.constant 0 : index
    %c0_22 = arith.constant 0 : index
    %20 = vector.load %arg1[%c0_20, %c3, %c0_21, %c0_22] : memref<4x4x2x32xf32, #tpu.memory_space<vmem>>, vector<4x1x2x32xf32>
    %21 = vector.shape_cast %20 : vector<4x1x2x32xf32> to vector<4x2x32xf32>
    %22 = vector.shape_cast %21 : vector<4x2x32xf32> to vector<8x32xf32>
    %c3_23 = arith.constant 3 : index
    %c0_24 = arith.constant 0 : index
    %c0_25 = arith.constant 0 : index
    %23 = vector.load %arg2[%c3_23, %c0_24, %c0_25] : memref<4x32x128xf32, #tpu.memory_space<vmem>>, vector<1x32x128xf32>
    %24 = vector.shape_cast %23 : vector<1x32x128xf32> to vector<32x128xf32>
    %cst_26 = arith.constant dense<0.000000e+00> : vector<8x128xf32>
    %25 = tpu.matmul %22, %24, %cst_26 {dimension_numbers = #tpu.dot_dimension_numbers<[1], [0], [0], [1], [0, 0, 1, 1], [], []>} : vector<8x32xf32>, vector<32x128xf32>, vector<8x128xf32> -> vector<8x128xf32>
    %26 = arith.addf %19, %25 : vector<8x128xf32>
    %27 = vector.shape_cast %26 : vector<8x128xf32> to vector<4x2x128xf32>
    %c0_27 = arith.constant 0 : index
    %c0_28 = arith.constant 0 : index
    %c0_29 = arith.constant 0 : index
    %28 = vector.load %arg3[%c0_27, %c0_28, %c0_29] : memref<4x2x128xf32, #tpu.memory_space<vmem>>, vector<4x2x128xf32>
    tpu.vector_store %arg3[%c0_27, %c0_28, %c0_29], %27 {strides = array<i32>} : memref<4x2x128xf32, #tpu.memory_space<vmem>>, vector<4x2x128xf32>,
    return
  }
  func.func @transform_0(%arg0: i32) -> (i32, i32, i32, i32) {
    %c0_i32 = arith.constant 0 : i32
    %c0_i32_0 = arith.constant 0 : i32
    %c0_i32_1 = arith.constant 0 : i32
    %c0_i32_2 = arith.constant 0 : i32
    return %arg0, %c0_i32, %c0_i32_0, %c0_i32_1 : i32, i32, i32, i32
  }
  func.func @transform_1(%arg0: i32) -> (i32, i32, i32) {
    %c0_i32 = arith.constant 0 : i32
    %c0_i32_0 = arith.constant 0 : i32
    %c0_i32_1 = arith.constant 0 : i32
    %c0_i32_2 = arith.constant 0 : i32
    return %c0_i32, %c0_i32_0, %c0_i32_1 : i32, i32, i32
  }
  func.func @transform_2(%arg0: i32) -> (i32, i32, i32) {
    %c0_i32 = arith.constant 0 : i32
    %c0_i32_0 = arith.constant 0 : i32
    %c0_i32_1 = arith.constant 0 : i32
    return %arg0, %c0_i32, %c0_i32_0 : i32, i32, i32
  }
}

</mosaic_0001>

<bundles_post_ra>
// kernel: iwt_forward.1
= control target key start
LH: loop header
LB: loop body
LE: loop exit
PB: predicated region body
PF: predicated region fallthrough
CT: control target
= control target key end

     0   :  { %s466_s9 = smov 0   ;;  %s557_s0 = inlined_call_operand.vmem [shape: f32[16,4,2,32], index: 0, kind: input, shape index: {}]   ;;  %s558_s1 = inlined_call_operand.vmem [shape: f32[4,32,128], index: 1, kind: input, shape index: {}]   ;;  %s559_s2 = inlined_call_operand.vmem [shape: f32[16,2,128], index: 2, kind: output, shape index: {}]  }
   0x1 LB: > { %s394_s10 = sadd.s32 4294967295, %s449_s9   ;;  %p398_p0 = scmp.ge.s32.totalorder %s449_s9, 1  ;;  %s449_s9 = sphi %s466_s9, %s12_s9  }
   0x2   : > { %p114_p1 = scmp.lt.s32.totalorder %s449_s9, 5 }
   0x4   : > { %p115_p2 = pnand %p398_p0, %p114_p1 }
   0x5   : > { %s399_s17 = sshll.u32 (!%p115_p2), %s394_s10, 2 }
   0x6   : > { %118 = sbr.rel (%p115_p2) target bundleno = 199 (0xc7), region = 28  ;;  %p138_p3 = scmp.lt.s32.totalorder (!%p115_p2), %s399_s17, 15 }
   0xb   : > { %v421_v0 = vld [vmem:[%s558_s1 + $0x58] sm:$0xff]  ;;  %v420_v1 = vld [vmem:[%s558_s1 + $0x50] sm:$0xff]  ;;  %v419_v5 = vld [vmem:[%s558_s1 + $0x48] sm:$0xff]  ;;  %s561_s17 = smov (!%p138_p3, %s399_s17), 15  ;;  %vm180_vm0 = vcmask 261120  }
   0xc   : > { %v430_v2 = vld [vmem:[%s558_s1 + $0x78] sm:$0xff]  ;;  %273 = vmatpush.msra.mxu2 %v421_v0  ;;  %v429_v6 = vld [vmem:[%s558_s1 + $0x70] sm:$0xff]  ;;  %v428_v9 = vld [vmem:[%s558_s1 + $0x68] sm:$0xff]  ;;  %s434_s6 = sshll.u32 %s561_s17, 3  ;;  %s403_s22 = sshll.u32 %s561_s17, 1 }
   0xd   : > { %318 = vmatpush.msra.mxu3 %v430_v2  ;;  %v411_v3 = vld [vmem:[%s558_s1 + $0x38] sm:$0xff]  ;;  %v410_v7 = vld [vmem:[%s558_s1 + $0x30] sm:$0xff]  ;;  %v418_v10 = vld [vmem:[%s558_s1 + $0x40] sm:$0xff]  ;;  %s513_s10 = scalar_lea.vmem %s557_s0, %s434_s6  ;;  %s148_s25 = scalar_lea.vmem %s559_s2, %s403_s22 }
   0xe   : > { %v157_v4 = vld [vmem:[%s558_s1 + $0x18] sm:$0xff]  ;;  %195 = vmatpush.msra.mxu0 %v411_v3  ;;  %v156_v8 = vld [vmem:[%s558_s1 + $0x10] sm:$0xff]  ;;  %274 = vmatpush.msra.mxu2 %v420_v1  ;;  %v404_v11 = vld [vmem:[%s513_s10 + $0x2] sm:$0x3] }
   0xf   : > { %229 = vmatpush.msra.mxu1 %v157_v4  ;;  %319 = vmatpush.msra.mxu3 %v429_v6  ;;  %v405_v12 = vld [vmem:[%s513_s10 + $0xa] sm:$0x3]  ;;  %v406_v13 = vld [vmem:[%s513_s10 + $0x12] sm:$0x3]  ;;  %v407_v14 = vld [vmem:[%s513_s10 + $0x1a] sm:$0x3] }
  0x10   : > { %196 = vmatpush.msra.mxu0 %v410_v7  ;;  %275 = vmatpush.msra.mxu2 %v419_v5  ;;  %172 = vst [vmem:[#allocation1] ss:$4 sm:$0xff] %v404_v11  ;;  %v409_v15 = vld [vmem:[%s558_s1 + $0x28] sm:$0xff]  ;;  %v427_v17 = vld [vmem:[%s558_s1 + $0x60] sm:$0xff]  ;;  %v152_v20 = vld [vmem:[%s513_s10 + $0x10] sm:$0x3] }
  0x11   : > { %230 = vmatpush.msra.mxu1 %v156_v8  ;;  %320 = vmatpush.msra.mxu3 %v428_v9  ;;  %174 = vst [vmem:[#allocation1 + $0x1] ss:$4 sm:$0xff] %v405_v12  ;;  %v155_v16 = vld [vmem:[%s558_s1 + $0x8] sm:$0xff]  ;;  %v150_v18 = vld [vmem:[%s513_s10] sm:$0x3] }
  0x12   : > { %276 = vmatpush.msra.mxu2 %v418_v10  ;;  %176 = vst [vmem:[#allocation1 + $0x2] ss:$4 sm:$0xff] %v406_v13  ;;  %197 = vmatpush.msra.mxu0 %v409_v15  ;;  %v151_v19 = vld [vmem:[%s513_s10 + $0x8] sm:$0x3]  ;;  %v153_v22 = vld [vmem:[%s513_s10 + $0x18] sm:$0x3] }
  0x13   : > { %178 = vst [vmem:[#allocation1 + $0x3] ss:$4 sm:$0xff] %v407_v14  ;;  %231 = vmatpush.msra.mxu1 %v155_v16  ;;  %321 = vmatpush.msra.mxu3 %v427_v17  ;;  %v408_v23 = vld [vmem:[%s558_s1 + $0x20] sm:$0xff]  ;;  %v415_v26 = vld [vmem:[%s513_s10 + $0xc] sm:$0x3] }
  0x14   : > { %v154_v24 = vld [vmem:[%s558_s1] sm:$0xff]  ;;  %198 = vmatpush.msra.mxu0 %v408_v23  ;;  %v416_v28 = vld [vmem:[%s513_s10 + $0x14] sm:$0x3]  ;;  %v417_v29 = vld [vmem:[%s513_s10 + $0x1c] sm:$0x3] }
  0x15   : > { %232 = vmatpush.msra.mxu1 %v154_v24  ;;  %v414_v25 = vld [vmem:[%s513_s10 + $0x4] sm:$0x3]  ;;  %v423_v30 = vld [vmem:[%s513_s10 + $0x6] sm:$0x3]  ;;  %v424_v31 = vld [vmem:[%s513_s10 + $0xe] sm:$0x3] }
  0x16   : > { %v425_v33 = vld [vmem:[%s513_s10 + $0x16] sm:$0x3]  ;;  %v426_v34 = vld [vmem:[%s513_s10 + $0x1e] sm:$0x3] }
  0x1a   : > { %v179_v21 = vld.sshfl [vmem:[#allocation1] sm:$0xff pattern:$0x73625140] }
  0x1b   : > { %207 = vst [vmem:[#allocation1] ss:$4 sm:$0xff] %v150_v18  ;;  %412 = vmatmul.msk.f32.vlgmr.msra.gmra.mxu0 %vm180_vm0, %v179_v21 }
  0x1c   : > { %209 = vst [vmem:[#allocation1 + $0x1] ss:$4 sm:$0xff] %v151_v19 }
  0x1d   : > { %211 = vst [vmem:[#allocation1 + $0x2] ss:$4 sm:$0xff] %v152_v20 }
  0x1e   : > { %213 = vst [vmem:[#allocation1 + $0x3] ss:$4 sm:$0xff] %v153_v22 }
  0x25   : > { %v214_v27 = vld.sshfl [vmem:[#allocation1] sm:$0xff pattern:$0x73625140] }
  0x26   : > { %251 = vst [vmem:[#allocation1] ss:$4 sm:$0xff] %v414_v25  ;;  %413 = vmatmul.msk.f32.vlgmr.msra.gmra.mxu1 %vm180_vm0, %v214_v27 }
  0x27   : > { %253 = vst [vmem:[#allocation1 + $0x1] ss:$4 sm:$0xff] %v415_v26 }
  0x28   : > { %255 = vst [vmem:[#allocation1 + $0x2] ss:$4 sm:$0xff] %v416_v28 }
  0x29   : > { %257 = vst [vmem:[#allocation1 + $0x3] ss:$4 sm:$0xff] %v417_v29 }
  0x30   : > { %v258_v32 = vld.sshfl [vmem:[#allocation1] sm:$0xff pattern:$0x73625140] }
  0x31   : > { %422 = vmatmul.msk.f32.vlgmr.msra.gmra.mxu2 %vm180_vm0, %v258_v32  ;;  %296 = vst [vmem:[#allocation1] ss:$4 sm:$0xff] %v423_v30 }
  0x32   : > { %298 = vst [vmem:[#allocation1 + $0x1] ss:$4 sm:$0xff] %v424_v31 }
  0x33   : > { %300 = vst [vmem:[#allocation1 + $0x2] ss:$4 sm:$0xff] %v425_v33 }
  0x34   : > { %302 = vst [vmem:[#allocation1 + $0x3] ss:$4 sm:$0xff] %v426_v34 }
  0x3b   : > { %v303_v35 = vld.sshfl [vmem:[#allocation1] sm:$0xff pattern:$0x73625140] }
  0x3c   : > { %431 = vmatmul.msk.f32.vlgmr.msra.gmra.mxu3 %vm180_vm0, %v303_v35 }
  0x98   : > { %v200_v36 = vpop.f32.mrf.mxu0 }
  0xa3   : > { %v234_v37 = vpop.f32.mrf.mxu1 }
  0xa4   : > { %v235_v38 = vadd.f32 %v234_v37, %v200_v36 }
  0xb4   : > { %v278_v39 = vpop.f32.mrf.mxu2 }
  0xb5   : > { %v281_v40 = vadd.f32 %v278_v39, %v235_v38 }
  0xbf   : > { %v323_v41 = vpop.f32.mrf.mxu3 }
  0xc0   : > { %v326_v42 = vadd.f32 %v323_v41, %v281_v40 }
  0xc2   : > { %v328_v43 = vrot.slane %v326_v42, 2  ;;  %v329_v44 = vrot.slane %v326_v42, 4  ;;  %v330_v45 = vrot.slane %v326_v42, 6  ;;  %334 = vst [vmem:[%s148_s25] sm:$0x3] %v326_v42 }
  0xc4   : > { %335 = vst [vmem:[%s148_s25 + $0x2] sm:$0x3] %v328_v43 }
  0xc5   : > { %336 = vst [vmem:[%s148_s25 + $0x4] sm:$0x3] %v329_v44 }
  0xc6   : > { %337 = vst [vmem:[%s148_s25 + $0x6] sm:$0x3] %v330_v45 }
  0xc7 PF: > { %s12_s9 = sadd.s32 1, %s449_s9  }
  0xc8   : > { %p9_p4 = scmp.ge.s32.totalorder %s12_s9, 6  }
  0xca   :  { %11 = sbr.rel (!%p9_p4) target bundleno = 1 (0x1), region = 76 }

</bundles_post_ra>
